<compile_context>
chip_gen: v7x
topology: tpu7x:2x2x1
jax: 0.10.0
libtpu: 0.0.40
codegen_flags: <defaults>
</compile_context>

<pallas_src>
import jax
import jax.numpy as jnp
from jax.experimental import pallas as pl
from jax.experimental.pallas import tpu as pltpu

_VMEM_BUDGET_BYTES = 12 * 1024 * 1024  # conservative: fits v5e's 16 MiB default scope


def _mlp_kernel(x_ref, w12_ref, b12_ref, w3_ref, b3_ref, o_ref):
    # x tile is the packed layout (TILE_R, PACK*D_in); cast is a no-op if the
    # caller already supplies bf16.
    x = x_ref[...].astype(jnp.bfloat16)

    # fused fc1+fc2 (block-diagonal packed weights) + ReLU, f32 accumulation.
    h = jnp.dot(x, w12_ref[...], preferred_element_type=jnp.float32) + b12_ref[...]
    h = jnp.maximum(h, 0.0)                                          # (TILE_R, PACK*32)

    # fc3 with the softmax pre-folded into +/- difference columns:
    # d holds [-delta, +delta] per packed sample pair.
    d = jnp.dot(h.astype(jnp.bfloat16), w3_ref[...],
                preferred_element_type=jnp.float32) + b3_ref[...]    # (TILE_R, PACK*2)

    # softmax over 2 classes == elementwise sigmoid of the signed difference.
    o_ref[...] = (1.0 / (1.0 + jnp.exp(-d))).astype(o_ref.dtype)


def _block_diag(w, n):
    """Expand (a, b) -> (n*a, n*b) block-diagonal with n copies of w."""
    a, b = w.shape
    eye = jnp.eye(n, dtype=w.dtype)
    return (eye[:, None, :, None] * w[None, :, None, :]).reshape(n * a, n * b)


def prepare_params(raw_params):
    """Fold fc1 into fc2, fold softmax(2 classes) into fc3, expand block-diagonally
    for the lane-dense packed layout, and cast weights to bf16."""
    w1, b1, w2, b2, w3, b3 = raw_params
    d_in = w1.shape[0]
    assert w3.shape[1] == 2, "softmax fold requires exactly 2 output classes"

    pack = 128 // d_in if 128 % d_in == 0 else 1   # batch rows packed per VMEM row

    # fc1 folded into fc2 (exact: fc1 has no nonlinearity).
    w12 = w1 @ w2                                   # (d_in, 32)
    b12 = b1 @ w2 + b2                              # (1, 32)

    # softmax fold: delta = h @ (w3[:,1]-w3[:,0]) + (b3[1]-b3[0]);
    # out = [sigmoid(-delta), sigmoid(+delta)].
    wd = w3[:, 1:2] - w3[:, 0:1]                    # (32, 1)
    bd = b3[:, 1:2] - b3[:, 0:1]                    # (1, 1)
    w3f = jnp.concatenate([-wd, wd], axis=1)        # (32, 2)
    b3f = jnp.concatenate([-bd, bd], axis=1)        # (1, 2)

    # Block-diagonal expansion for the packed layout.
    w12p = _block_diag(w12, pack).astype(jnp.bfloat16)     # (pack*d_in, pack*32)
    b12p = jnp.tile(b12, (1, pack)).astype(jnp.float32)    # (1, pack*32)
    w3p = _block_diag(w3f, pack).astype(jnp.bfloat16)      # (pack*32, pack*2)
    b3p = jnp.tile(b3f, (1, pack)).astype(jnp.float32)     # (1, pack*2)
    return (w12p, b12p, w3p, b3p)


def depression_model_forward(x, prepared_params, *, tile_b=8192):
    """x: (batch, input_size) f32 or bf16. Returns (batch, 2) softmax probs (f32)."""
    w12p, b12p, w3p, b3p = prepared_params
    batch, d_in = x.shape
    k_packed = w12p.shape[0]                 # pack * d_in
    pack = k_packed // d_in
    n_hid_packed = w12p.shape[1]             # pack * 32
    n_out_packed = w3p.shape[1]              # pack * 2
    n_out = n_out_packed // pack             # 2

    # ---- tile selection (packed rows; 1 packed row == `pack` batch rows) ----
    rows_needed = pl.cdiv(batch, pack)
    rows8 = pl.cdiv(rows_needed, 8) * 8                      # sublane multiple
    tile_rows = max(8, (tile_b // pack) // 8 * 8)
    # Clamp against a VMEM budget (x + out tiles, double-buffered, lane-padded),
    # not just the batch, so huge tile_b never overruns any chip's default scope.
    bytes_per_packed_row = 2 * (k_packed * x.dtype.itemsize + 128 * 4)
    tile_rows = min(tile_rows, max(8, (_VMEM_BUDGET_BYTES // bytes_per_packed_row) // 8 * 8))
    tile_rows = min(tile_rows, rows8)
    # v7x megacore: keep >= 2 grid steps whenever the batch is big enough.
    if tile_rows >= rows8 and rows8 >= 16:
        tile_rows = pl.cdiv(rows8 // 2, 8) * 8

    padded_rows = pl.cdiv(rows_needed, tile_rows) * tile_rows
    padded = padded_rows * pack
    if padded != batch:
        x = jnp.pad(x, ((0, padded - batch), (0, 0)))
    # Free row-major reshape: 8 consecutive batch rows per 128-lane VMEM row.
    xp = x.reshape(padded_rows, k_packed)

    grid = (padded_rows // tile_rows,)

    # Weights/biases: whole array as one block, constant index_map -> VMEM-resident.
    resident = lambda shape: pl.BlockSpec(shape, lambda i, _s=shape: (0,) * len(_s))

    flops = 2 * padded_rows * (k_packed * n_hid_packed + n_hid_packed * n_out_packed)
    bytes_accessed = (
        int(xp.size) * xp.dtype.itemsize
        + sum(int(a.size) * a.dtype.itemsize for a in prepared_params)
        + padded_rows * n_out_packed * 4
    )

    out_packed = pl.pallas_call(
        _mlp_kernel,
        out_shape=jax.ShapeDtypeStruct((padded_rows, n_out_packed), jnp.float32),
        grid=grid,
        in_specs=[
            pl.BlockSpec((tile_rows, k_packed), lambda i: (i, 0)),   # x: batch-tiled
            resident(w12p.shape), resident(b12p.shape),
            resident(w3p.shape), resident(b3p.shape),
        ],
        out_specs=pl.BlockSpec((tile_rows, n_out_packed), lambda i: (i, 0)),
        compiler_params=pltpu.CompilerParams(
            dimension_semantics=("parallel",)),                      # megacore on v7x
        cost_estimate=pl.CostEstimate(
            flops=flops,
            transcendentals=2 * padded,                              # 2 sigmoids per row
            bytes_accessed=bytes_accessed),
    )(xp, w12p, b12p, w3p, b3p)

    # Free row-major reshape back to (padded, 2), then drop padding.
    return out_packed.reshape(padded, n_out)[:batch]


def init_params(key, input_size):
    """Deterministic synthetic init (PyTorch-style uniform fan-in bounds), f32."""
    def linear(key, fan_in, fan_out):
        k_w, k_b = jax.random.split(key)
        bound = 1.0 / jnp.sqrt(fan_in)
        w = jax.random.uniform(k_w, (fan_in, fan_out), jnp.float32, -bound, bound)
        b = jax.random.uniform(k_b, (1, fan_out), jnp.float32, -bound, bound)
        return w, b

    k1, k2, k3 = jax.random.split(key, 3)
    w1, b1 = linear(k1, input_size, 64)
    w2, b2 = linear(k2, 64, 32)
    w3, b3 = linear(k3, 32, 2)
    return (w1, b1, w2, b2, w3, b3)


def reference_forward_f32(x, raw_params):
    """Exact f32 forward, matching the PyTorch module semantics."""
    w1, b1, w2, b2, w3, b3 = raw_params
    h1 = x @ w1 + b1
    h2 = jnp.maximum(h1 @ w2 + b2, 0.0)
    logits = h2 @ w3 + b3
    return jax.nn.softmax(logits, axis=1)


def reference_forward_folded_bf16(x, raw_params):
    """Same folded/bf16 arithmetic as the kernel, in plain JAX (tight check)."""
    w1, b1, w2, b2, w3, b3 = raw_params
    w12 = (w1 @ w2).astype(jnp.bfloat16)
    b12 = (b1 @ w2 + b2).astype(jnp.float32)
    wd = w3[:, 1:2] - w3[:, 0:1]
    bd = b3[:, 1:2] - b3[:, 0:1]
    w3f = jnp.concatenate([-wd, wd], axis=1).astype(jnp.bfloat16)
    b3f = jnp.concatenate([-bd, bd], axis=1).astype(jnp.float32)
    h = jnp.dot(x.astype(jnp.bfloat16), w12, preferred_element_type=jnp.float32) + b12
    h = jnp.maximum(h, 0.0)
    d = jnp.dot(h.astype(jnp.bfloat16), w3f, preferred_element_type=jnp.float32) + b3f
    return 1.0 / (1.0 + jnp.exp(-d))


if __name__ == "__main__":
    key = jax.random.PRNGKey(0)
    k_x, k_p = jax.random.split(key)

    batch, input_size = 100, 16            # non-multiple-of-tile batch -> padding path
    x = jax.random.normal(k_x, (batch, input_size), jnp.float32)
    raw_params = init_params(k_p, input_size)
    params = prepare_params(raw_params)

    # Small tile so the batch grid has >= 2 steps and pipelining is exercised.
    out = depression_model_forward(x, params, tile_b=32)
    out = jax.block_until_ready(out)
    assert out.shape == (batch, 2)

    # Also exercise the default (large-tile) path.
    out_big = jax.block_until_ready(depression_model_forward(x, params))
    assert jnp.allclose(out, out_big, atol=1e-6), "tile size must not change results"

    ref_bf16 = reference_forward_folded_bf16(x, raw_params)  # same arithmetic -> tight
    ref_f32 = reference_forward_f32(x, raw_params)           # exact module math -> loose
    assert jnp.allclose(out, ref_bf16, atol=5e-3, rtol=5e-3), "mismatch vs folded bf16 reference"
    assert jnp.allclose(out, ref_f32, atol=3e-2, rtol=3e-2), "mismatch vs exact f32 reference"
    assert jnp.allclose(jnp.sum(out, axis=1), 1.0, atol=1e-3), "softmax rows must sum to ~1"

    print("KERNEL_OK")
</pallas_src>

<mosaic_0001>
module attributes {stable_mosaic.version = 11 : i64} {
  func.func @_mlp_kernel(%arg0: i32, %arg1: memref<8x128xf32, #tpu.memory_space<vmem>>, %arg2: memref<128x256xbf16, #tpu.memory_space<vmem>>, %arg3: memref<1x256xf32, #tpu.memory_space<vmem>>, %arg4: memref<256x16xbf16, #tpu.memory_space<vmem>>, %arg5: memref<1x16xf32, #tpu.memory_space<vmem>>, %arg6: memref<8x16xf32, #tpu.memory_space<vmem>>) attributes {dimension_semantics = [#tpu.dimension_semantics<parallel>], iteration_bounds = array<i64: 2>, scalar_prefetch = 0 : i64, scratch_operands = 0 : i64, tpu.core_type = #tpu.core_type<tc>, window_params = [{transform_indices = @transform_0, window_bounds = array<i64: 8, 128>}, {pipeline_mode = #tpu.pipeline_mode<synchronous>, transform_indices = @transform_1, window_bounds = array<i64: 128, 256>}, {pipeline_mode = #tpu.pipeline_mode<synchronous>, transform_indices = @transform_2, window_bounds = array<i64: 1, 256>}, {pipeline_mode = #tpu.pipeline_mode<synchronous>, transform_indices = @transform_3, window_bounds = array<i64: 256, 16>}, {pipeline_mode = #tpu.pipeline_mode<synchronous>, transform_indices = @transform_4, window_bounds = array<i64: 1, 16>}, {transform_indices = @transform_5, window_bounds = array<i64: 8, 16>}]} {
    %c0 = arith.constant 0 : index
    %c0_0 = arith.constant 0 : index
    %0 = vector.load %arg1[%c0, %c0_0] : memref<8x128xf32, #tpu.memory_space<vmem>>, vector<8x128xf32>
    %1 = arith.truncf %0 : vector<8x128xf32> to vector<8x128xbf16>
    %c0_1 = arith.constant 0 : index
    %c0_2 = arith.constant 0 : index
    %2 = vector.load %arg2[%c0_1, %c0_2] : memref<128x256xbf16, #tpu.memory_space<vmem>>, vector<128x256xbf16>
    %cst = arith.constant dense<0.000000e+00> : vector<8x256xf32>
    %3 = tpu.matmul %1, %2, %cst {dimension_numbers = #tpu.dot_dimension_numbers<[1], [0], [0], [1], [0, 0, 1, 1], [], []>} : vector<8x128xbf16>, vector<128x256xbf16>, vector<8x256xf32> -> vector<8x256xf32>
    %c0_3 = arith.constant 0 : index
    %c0_4 = arith.constant 0 : index
    %4 = vector.load %arg3[%c0_3, %c0_4] : memref<1x256xf32, #tpu.memory_space<vmem>>, vector<1x256xf32>
    %5 = vector.broadcast %4 : vector<1x256xf32> to vector<8x256xf32>
    %6 = arith.addf %3, %5 : vector<8x256xf32>
    %cst_5 = arith.constant 0.000000e+00 : f32
    %7 = vector.broadcast %cst_5 : f32 to vector<8x256xf32>
    %8 = arith.maximumf %6, %7 : vector<8x256xf32>
    %9 = arith.truncf %8 : vector<8x256xf32> to vector<8x256xbf16>
    %c0_6 = arith.constant 0 : index
    %c0_7 = arith.constant 0 : index
    %10 = vector.load %arg4[%c0_6, %c0_7] : memref<256x16xbf16, #tpu.memory_space<vmem>>, vector<256x16xbf16>
    %cst_8 = arith.constant dense<0.000000e+00> : vector<8x16xf32>
    %11 = tpu.matmul %9, %10, %cst_8 {dimension_numbers = #tpu.dot_dimension_numbers<[1], [0], [0], [1], [0, 0, 1, 1], [], []>} : vector<8x256xbf16>, vector<256x16xbf16>, vector<8x16xf32> -> vector<8x16xf32>
    %c0_9 = arith.constant 0 : index
    %c0_10 = arith.constant 0 : index
    %12 = vector.load %arg5[%c0_9, %c0_10] : memref<1x16xf32, #tpu.memory_space<vmem>>, vector<1x16xf32>
    %13 = vector.broadcast %12 : vector<1x16xf32> to vector<8x16xf32>
    %14 = arith.addf %11, %13 : vector<8x16xf32>
    %cst_11 = arith.constant 0.000000e+00 : f32
    %15 = vector.broadcast %cst_11 : f32 to vector<8x16xf32>
    %16 = arith.subf %15, %14 : vector<8x16xf32>
    %17 = math.exp %16 : vector<8x16xf32>
    %cst_12 = arith.constant 1.000000e+00 : f32
    %18 = vector.broadcast %cst_12 : f32 to vector<8x16xf32>
    %19 = arith.addf %18, %17 : vector<8x16xf32>
    %cst_13 = arith.constant 1.000000e+00 : f32
    %20 = vector.broadcast %cst_13 : f32 to vector<8x16xf32>
    %21 = arith.divf %20, %19 : vector<8x16xf32>
    %c0_14 = arith.constant 0 : index
    %c0_15 = arith.constant 0 : index
    %22 = vector.load %arg6[%c0_14, %c0_15] : memref<8x16xf32, #tpu.memory_space<vmem>>, vector<8x16xf32>
    tpu.vector_store %arg6[%c0_14, %c0_15], %21 {strides = array<i32>} : memref<8x16xf32, #tpu.memory_space<vmem>>, vector<8x16xf32>,
    return
  }
  func.func @transform_0(%arg0: i32) -> (i32, i32) {
    %c0_i32 = arith.constant 0 : i32
    %c0_i32_0 = arith.constant 0 : i32
    return %arg0, %c0_i32 : i32, i32
  }
  func.func @transform_1(%arg0: i32) -> (i32, i32) {
    %c0_i32 = arith.constant 0 : i32
    %c0_i32_0 = arith.constant 0 : i32
    %c0_i32_1 = arith.constant 0 : i32
    return %c0_i32, %c0_i32_0 : i32, i32
  }
  func.func @transform_2(%arg0: i32) -> (i32, i32) {
    %c0_i32 = arith.constant 0 : i32
    %c0_i32_0 = arith.constant 0 : i32
    %c0_i32_1 = arith.constant 0 : i32
    return %c0_i32, %c0_i32_0 : i32, i32
  }
  func.func @transform_3(%arg0: i32) -> (i32, i32) {
    %c0_i32 = arith.constant 0 : i32
    %c0_i32_0 = arith.constant 0 : i32
    %c0_i32_1 = arith.constant 0 : i32
    return %c0_i32, %c0_i32_0 : i32, i32
  }
  func.func @transform_4(%arg0: i32) -> (i32, i32) {
    %c0_i32 = arith.constant 0 : i32
    %c0_i32_0 = arith.constant 0 : i32
    %c0_i32_1 = arith.constant 0 : i32
    return %c0_i32, %c0_i32_0 : i32, i32
  }
  func.func @transform_5(%arg0: i32) -> (i32, i32) {
    %c0_i32 = arith.constant 0 : i32
    %c0_i32_0 = arith.constant 0 : i32
    return %arg0, %c0_i32 : i32, i32
  }
}

</mosaic_0001>

<bundles_post_ra>
// kernel: tpu_custom_call.1
= control target key start
LH: loop header
LB: loop body
LE: loop exit
PB: predicated region body
PF: predicated region fallthrough
CT: control target
= control target key end

     0   :  { %10 = vsyncpa [#allocation3], 0  ;;  %s1079_s0 = inlined_call_operand.vmem [shape: f32[16,128], index: 0, kind: input, shape index: {}]   ;;  %s1080_s1 = inlined_call_operand.vmem [shape: bf16[128,256], index: 1, kind: input, shape index: {}]   ;;  %s1081_s2 = inlined_call_operand.vmem [shape: f32[1,256], index: 2, kind: input, shape index: {}]   ;;  %s1082_s3 = inlined_call_operand.vmem [shape: bf16[256,16], index: 3, kind: input, shape index: {}]   ;;  %s1083_s4 = inlined_call_operand.vmem [shape: f32[1,16], index: 4, kind: input, shape index: {}]   ;;  %s1084_s5 = inlined_call_operand.hbm [shape: f32[16,16], index: 5, kind: output, shape index: {}]  }
   0x1   :  { %12 = vsyncpa [#allocation3 + $0x1], 0  ;;  %s877_s18 = smov 0   ;;  %s879_s19 = smov 0  }
   0x2   :  { %s881_s20 = smov 0   ;;  %s883_s21 = smov 0  }
   0x3 LB: > { %s898_s22 = sadd.s32 4294967295, %s843_s21   ;;  %s632_s23 = sadd.s32 4294967294, %s843_s21   ;;  %s843_s21 = sphi %s883_s21, %s1090_s21   ;;  %s839_s20 = sphi %s881_s20, %s1089_s20   ;;  %s835_s19 = sphi %s879_s19, %s1088_s19   ;;  %s831_s18 = sphi %s877_s18, %s1087_s18  }
   0x4   : > { %s902_s24 = sadd.s32 1, %s843_s21   ;;  %s135_s25 = sadd.s32 1, %s839_s20 }
   0x5   : > { %s132_s26 = ssub.s32 %s843_s21, %s902_s24  ;;  %p145_p0 = scmp.ne.s32.totalorder %s839_s20, %s835_s19 }
   0x6   : > { %p133_p1 = scmp.eq.s32.totalorder %s132_s26, 0  ;;  %p146_p2 = scmp.eq.s32.totalorder %s898_s22, 1 }
   0x7   : > { %p151_p3 = scmp.ne.s32.totalorder %s835_s19, %s831_s18  ;;  %p152_p4 = scmp.eq.s32.totalorder %s632_s23, 1 }
   0x8   : > { %s913_s27 = scalar_select %p133_p1, %s839_s20, %s135_s25  }
   0x9   : > { %p915_p5 = por %p146_p2, %p145_p0  ;;  %p919_p6 = por %p152_p4, %p151_p3 }
   0xa   : > { %p635_p7 = scmp.ge.s32.totalorder %s843_s21, 1  ;;  %p189_p8 = scmp.lt.s32.totalorder %s843_s21, 3 }
   0xc   : > { %p190_p9 = pnand %p635_p7, %p189_p8 }
   0xd   : > { %v737_v0 = vld [vmem:[%s1080_s1 + $0x4] ss:$8 sps:$4 sm:$0xff] (!%p190_p9)   ;;  %v739_v1 = vld [vmem:[%s1080_s1] ss:$8 sps:$4 sm:$0xff] (!%p190_p9)   ;;  %v845_v2 = vmov (!%p190_p9), 0   ;;  %p216_p10 = scmp.lt.s32.totalorder (!%p190_p9), %s898_s22, 1  ;;  %v241_v35 = vlaneseq (!%p190_p9) }
   0xe   : > { %193 = sbr.rel (%p190_p9) target bundleno = 525 (0x20d), region = 40  ;;  %363 = vmatprep.mubr.bf16.mxu0 (!%p190_p9), %v845_v2  ;;  %331 = vmatprep.subr.bf16.mxu0 (!%p190_p9), %v737_v0  ;;  %v740_v3 = vld [vmem:[%s1080_s1 + $0x14] ss:$8 sps:$4 sm:$0xff] (!%p190_p9)   ;;  %v742_v4 = vld [vmem:[%s1080_s1 + $0x10] ss:$8 sps:$4 sm:$0xff] (!%p190_p9)   ;;  %v761_v10 = vld [vmem:[%s1082_s3 + $0x40] sm:$0xff] (!%p190_p9)  }
   0xf   : > { %332 = vmatpush1.bf16.msra.mxu0 (!%p190_p9), %v739_v1  ;;  %v743_v5 = vld [vmem:[%s1080_s1 + $0x24] ss:$8 sps:$4 sm:$0xff] (!%p190_p9)   ;;  %v745_v6 = vld [vmem:[%s1080_s1 + $0x20] ss:$8 sps:$4 sm:$0xff] (!%p190_p9)   ;;  %v746_v7 = vld [vmem:[%s1080_s1 + $0x34] ss:$8 sps:$4 sm:$0xff] (!%p190_p9)   ;;  %675 = vmatprep.subr.bf16.mxu1 (!%p190_p9), %v761_v10 }
  0x10   : > { %333 = vmatprep.subr.bf16.mxu0 (!%p190_p9), %v740_v3  ;;  %v748_v8 = vld [vmem:[%s1080_s1 + $0x30] ss:$8 sps:$4 sm:$0xff] (!%p190_p9)   ;;  %v749_v9 = vld [vmem:[%s1080_s1 + $0x44] ss:$8 sps:$4 sm:$0xff] (!%p190_p9)   ;;  %v751_v12 = vld [vmem:[%s1080_s1 + $0x40] ss:$8 sps:$4 sm:$0xff] (!%p190_p9)  }
  0x11   : > { %v762_v11 = vld [vmem:[%s1082_s3] sm:$0xff] (!%p190_p9)   ;;  %v763_v13 = vld [vmem:[%s1082_s3 + $0x48] sm:$0xff] (!%p190_p9)   ;;  %v765_v15 = vld [vmem:[%s1082_s3 + $0x50] sm:$0xff] (!%p190_p9)   ;;  %v242_v36 = vshrl.u32 (!%p190_p9), %v241_v35, 7  ;;  %s213_s15 = sand.u32 (!%p190_p9), 1, %s835_s19   ;;  %vm557_vm0 = vcmask (!%p190_p9), 130048  }
  0x12   : > { %676 = vmatpush3.bf16.msra.mxu1 (!%p190_p9), %v762_v11  ;;  %v764_v14 = vld [vmem:[%s1082_s3 + $0x8] sm:$0xff] (!%p190_p9)   ;;  %v752_v16 = vld [vmem:[%s1080_s1 + $0x54] ss:$8 sps:$4 sm:$0xff] (!%p190_p9)   ;;  %v754_v17 = vld [vmem:[%s1080_s1 + $0x50] ss:$8 sps:$4 sm:$0xff] (!%p190_p9)   ;;  %s636_s16 = sshll.u32 (!%p190_p9), %s213_s15, 3 }
  0x13   : > { %334 = vmatpush1.bf16.msra.mxu0 (!%p190_p9), %v742_v4  ;;  %677 = vmatprep.subr.bf16.mxu1 (!%p190_p9), %v763_v13  ;;  %v766_v18 = vld [vmem:[%s1082_s3 + $0x10] sm:$0xff] (!%p190_p9)   ;;  %v767_v19 = vld [vmem:[%s1082_s3 + $0x58] sm:$0xff] (!%p190_p9)   ;;  %v755_v20 = vld [vmem:[%s1080_s1 + $0x64] ss:$8 sps:$4 sm:$0xff] (!%p190_p9)   ;;  %v243_v37 = vsub.s32 (!%p190_p9), 0, %v242_v36  ;;  %v247_v39 = vsub.s32 (!%p190_p9), 1, %v242_v36 }
  0x14   : > { %335 = vmatprep.subr.bf16.mxu0 (!%p190_p9), %v743_v5  ;;  %v757_v21 = vld [vmem:[%s1080_s1 + $0x60] ss:$8 sps:$4 sm:$0xff] (!%p190_p9)   ;;  %v758_v22 = vld [vmem:[%s1080_s1 + $0x74] ss:$8 sps:$4 sm:$0xff] (!%p190_p9)   ;;  %v760_v26 = vld [vmem:[%s1080_s1 + $0x70] ss:$8 sps:$4 sm:$0xff] (!%p190_p9)  }
  0x15   : > { %s217_s17 = scalar_select %p216_p10, %s898_s22, 1  ;;  %v768_v23 = vld [vmem:[%s1082_s3 + $0x18] sm:$0xff]   ;;  %v769_v24 = vld [vmem:[%s1082_s3 + $0x60] sm:$0xff]   ;;  %v771_v28 = vld [vmem:[%s1082_s3 + $0x68] sm:$0xff]  }
  0x16   : > { %678 = vmatpush3.bf16.msra.mxu1 %v764_v14  ;;  %v770_v25 = vld [vmem:[%s1082_s3 + $0x20] sm:$0xff]   ;;  %v772_v30 = vld [vmem:[%s1082_s3 + $0x28] sm:$0xff]   ;;  %v773_v31 = vld [vmem:[%s1082_s3 + $0x70] sm:$0xff]   ;;  %s215_s23 = scalar_lea.vmem [#allocation2], %s636_s16  ;;  %s560_s6 = scalar_lea.sflag [#allocation3], %s213_s15 }
  0x17   : > { %336 = vmatpush1.bf16.msra.mxu0 %v745_v6  ;;  %s637_s10 = sshll.u32 %s217_s17, 3  ;;  %679 = vmatprep.subr.bf16.mxu1 %v765_v15  ;;  %v774_v32 = vld [vmem:[%s1082_s3 + $0x30] sm:$0xff]   ;;  %v775_v33 = vld [vmem:[%s1082_s3 + $0x78] sm:$0xff]   ;;  %v239_v38 = vld [vmem:[%s1081_s2] sm:$0x3]  ;;  %s573_s25 = sshll.u32 %s215_s23, 4  ;;  %s1039_s25 = int_to_ptr.vmem [resolvable:$true] %s573_s25 }
  0x18   : > { %337 = vmatprep.subr.bf16.mxu0 %v746_v7  ;;  %s219_s9 = scalar_lea.vmem %s1079_s0, %s637_s10  ;;  %v776_v34 = vld [vmem:[%s1082_s3 + $0x38] sm:$0xff]   ;;  %v244_v40 = vrot.slane %v239_v38, %v243_v37  ;;  %v248_v41 = vrot.slane %v239_v38, %v247_v39  ;;  %v654_v53 = vld [vmem:[%s1083_s4] ss:$0 sm:$0xff]  ;;  %s672_s10 = sshll.u32 %s898_s22, 7 }
  0x19   : > { %v221_v27 = vld [vmem:[%s219_s9] sm:$0xff]  ;;  %s1037_s30 = scalar_lea.hbm %s1084_s5, %s672_s10  ;;  %s781_s7 = scalar_lea.vmem %s1039_s25, 128 }
  0x1a   : > { %680 = vmatpush3.bf16.msra.mxu1 %v766_v18  ;;  %v222_v29 = vpack.c.bf16 %v221_v27, %v221_v27  ;;  %p782_p11 = scmp.ne.s32.totalorder %s1039_s25, %s781_s7  ;;  %s846_s22 = smov [#allocation2]  }
  0x1b   : > { %338 = vmatpush1.bf16.msra.mxu0 %v748_v8  ;;  %681 = vmatprep.subr.bf16.mxu1 %v767_v19  ;;  %s785_s8 = sshll.u32 %s846_s22, 4  ;;  %s786_s8 = int_to_ptr.vmem [resolvable:$false] %s785_s8 }
  0x1c   : > { %339 = vmatprep.subr.bf16.mxu0 %v749_v9  ;;  %p783_p12 = pnand %p782_p11, %p915_p5  ;;  %s787_s9 = scalar_lea.vmem %s786_s8, 256 }
  0x1d   : > { %p788_p0 = scmp.lt.s32.totalorder %s1039_s25, %s786_s8  ;;  %p789_p1 = scmp.lt.s32.totalorder %s787_s9, %s781_s7 }
  0x1e   : > { %682 = vmatpush3.bf16.msra.mxu1 %v768_v23  ;;  %p784_p13 = pneg %p783_p12 }
  0x1f   : > { %340 = vmatpush1.bf16.msra.mxu0 %v751_v12  ;;  %683 = vmatprep.subr.bf16.mxu1 %v769_v24  ;;  %p790_p2 = por %p789_p1, %p788_p0 }
  0x20   : > { %341 = vmatprep.subr.bf16.mxu0 %v752_v16 }
  0x21   : > { %p791_p3 = pnand %p790_p2, %p784_p13 }
  0x22   : > { %684 = vmatpush3.bf16.msra.mxu1 %v770_v25 }
  0x23   : > { %342 = vmatpush1.bf16.msra.mxu0 %v754_v17  ;;  %685 = vmatprep.subr.bf16.mxu1 %v771_v28 }
  0x24   : > { %343 = vmatprep.subr.bf16.mxu0 %v755_v20 }
  0x26   : > { %686 = vmatpush3.bf16.msra.mxu1 %v772_v30 }
  0x27   : > { %344 = vmatpush1.bf16.msra.mxu0 %v757_v21  ;;  %687 = vmatprep.subr.bf16.mxu1 %v773_v31 }
  0x28   : > { %345 = vmatprep.subr.bf16.mxu0 %v758_v22 }
  0x2a   : > { %688 = vmatpush3.bf16.msra.mxu1 %v774_v32 }
  0x2b   : > { %346 = vmatpush1.bf16.msra.mxu0 %v760_v26  ;;  %689 = vmatprep.subr.bf16.mxu1 %v775_v33 }
  0x2e   : > { %364 = vmatmul.mubr.bf16.vlgmr.msra.gmra.mrb[0].mxu0 %v222_v29  ;;  %690 = vmatpush3.bf16.msra.mxu1 %v776_v34 }
 0x101   : > { %v365_v42 = vpop.f32.mrb[0].mxu0 }
 0x102   : > { %v366_v43 = vadd.f32 %v365_v42, %v244_v40  ;;  %v367_v44 = vpop.f32.mrb[1].mxu0 }
 0x103   : > { %v368_v45 = vadd.f32 %v367_v44, %v248_v41  ;;  %v369_v46 = vpop.f32.mrb[2].mxu0 }
 0x104   : > { %v372_v47 = vmax.f32 %v366_v43, 0.0  ;;  %v370_v48 = vpop.f32.mrb[3].mxu0 }
 0x105   : > { %v373_v49 = vmax.f32 %v368_v45, 0.0 }
 0x106   : > { %v374_v51 = vpack.c.bf16 %v372_v47, %v372_v47 }
 0x107   : > { %v375_v50 = vpack.c.bf16 %v373_v49, %v373_v49 }
 0x109   : > { %543 = vmatprep.mubr.bf16.mxu1 %v375_v50 }
 0x10a   : > { %544 = vmatmul.mubr.bf16.vlgmr.msra.gmra.mrb[0].mxu1 %v374_v51 }
 0x1dd   : > { %v691_v52 = vpop.f32.mrb[0].mxu1 }
 0x1de   : > { %v692_v54 = vpop.f32.mrb[1].mxu1 }
 0x1df   : > { %v693_v55 = vadd.f32 %v692_v54, %v691_v52  ;;  %v694_v56 = vpop.f32.mrb[2].mxu1 }
 0x1e0   : > { %v695_v57 = vpop.f32.mrb[3].mxu1 }
 0x1e1   : > { %v546_v58 = vadd.f32 %v693_v55, %v654_v53 }
 0x1e3   : > { %v551_v59 = vsub.f32 0.0, %v546_v58 }
 0x1e5   : > { %v552_v60 = vmul.f32 1.442695, %v551_v59 }
 0x1e7   : > { %777 = vpow2.f32 %v552_v60 }
 0x1f1   : > { %v778_v61 = vpop.eup %777 }
 0x1f2   : > { %v554_v62 = vadd.f32 1.0, %v778_v61 }
 0x1f4   : > { %779 = vrcp.f32 %v554_v62 }
 0x1fe   : > { %v780_v63 = vpop.eup %779 }
 0x1ff   : > { %558 = vst.msk [vmem:[%s215_s23] sm:$0xff] %vm557_vm0, %v780_v63 }
 0x200   : > { %794 = shalt.err (!%p791_p3)
}
 0x201   : > { %s795_s11 = scalar_lea.hbm %s1037_s30, 128  ;;  %s799_s14 = scalar_lea.hbm %s1084_s5, 256 }
 0x202   : > { %p796_p4 = scmp.ne.s32.totalorder %s1037_s30, %s795_s11  ;;  %p800_p9 = scmp.lt.u32.totalorder %s1037_s30, %s1084_s5 }
 0x203   : > { %p801_p10 = scmp.lt.u32.totalorder %s799_s14, %s795_s11  ;;  %p803_p12 = scmp.lt.u32.totalorder %s795_s11, %s1037_s30 }
 0x204   : > { %p797_p7 = pnand %p796_p4, %p915_p5 }
 0x205   : > { %p802_p11 = por %p801_p10, %p800_p9 }
 0x206   : > { %p798_p8 = pneg %p797_p7 }
 0x207   : > { %p804_p13 = por %p803_p12, %p802_p11 }
 0x209   : > { %p805_p0 = pnand %p804_p13, %p798_p8 }
 0x20b   : > { %808 = shalt.err (!%p805_p0)
}
 0x20c   : > { %697 = dma.vmem_to_hbm [thread:$0]  (%p915_p5), %s1039_s25, 128, %s1037_s30, %s560_s6  }
 0x20d PF: > { %p703_p1 = scmp.ge.s32.totalorder %s843_s21, 2  ;;  %s585_s10 = sand.u32 1, %s831_s18  }
 0x20e   : > { %s586_s23 = scalar_lea.sflag [#allocation3], %s585_s10 }
 0x20f   : > { %p700_p2 = pnand %p703_p1, %p919_p6 }
 0x211   : > { %826 = dma.done.wait (!%p700_p2), %s586_s23, 128  }
 0x212   : > { %828 = vsyncadd (!%p700_p2), %s586_s23, 4294967168  ;;  %p15_p3 = scmp.ge.s32.totalorder %s902_s24, 4   ;;  %s1087_s18 = smov %s835_s19 }
 0x213   : > { %s1088_s19 = smov %s839_s20  ;;  %s1089_s20 = smov %s913_s27 }
 0x214   : > { %s1090_s21 = smov %s902_s24  ;;  %17 = sbr.rel (!%p15_p3) target bundleno = 3 (0x3), region = 75 }
 0x21b   :  { %591 = vsyncpa [#allocation3], 1 }
 0x21c   :  { %593 = vsyncpa [#allocation3 + $0x1], 1 }

</bundles_post_ra>
